<compile_context>
chip_gen: v5e
topology: v5e:2x2
jax: 0.10.0
libtpu: 0.0.40
codegen_flags: <defaults>
</compile_context>

<pallas_src>
import functools

import jax
import jax.numpy as jnp
from jax.experimental import pallas as pl
from jax.experimental.pallas import tpu as pltpu

_LANES = 128
_SUB_CHUNK_ROWS = 2048                 # rows per in-kernel compute chunk (1 MiB f32)
_IMG_TILE_BYTES = 4 * 1024 * 1024      # per-input per-buffer DMA tile budget
_FEAT_FUSE_LIMIT_BYTES = 4 * 1024 * 1024
_NUM_CORES = 2                         # leading "parallel" axis (v7x megacore)


def _round_up(n, m):
    return ((n + m - 1) // m) * m


def _round_down(n, m):
    return (n // m) * m


def _sublane_multiple(dtype):
    # f32 -> 8, bf16 -> 16, int8/fp8 -> 32 (sub-32-bit dtypes pack along sublanes).
    return max(8, 32 // jnp.dtype(dtype).itemsize)


def _padded_slab(x, row_multiple):
    """Flatten + zero-pad to a (rows, 128) slab with rows % row_multiple == 0.

    Materializes a copy only when padding is actually needed; used for the
    small feat ("curve") tensors and as a fallback for lane-misaligned images.
    """
    flat = x.reshape(-1)
    rows = _round_up(pl.cdiv(flat.size, _LANES), row_multiple)
    pad = rows * _LANES - flat.size
    if pad:
        flat = jnp.pad(flat, (0, pad))
    return flat.reshape(rows, _LANES)


def _tandem_partials_kernel(*refs, rows_imag, include_feat):
    """Per-core partial sums: out row = [feat_sq_sum, imag_sq_sum, mismatch_count]."""
    if include_feat:
        (fr_ref, fp_ref, ir_ref, ip_ref, out_ref,
         feat_acc, img_acc, mis_acc) = refs
    else:
        ir_ref, ip_ref, out_ref, feat_acc, img_acc, mis_acc = refs
        fr_ref = fp_ref = None

    c = pl.program_id(0)          # TensorCore shard ("parallel")
    j = pl.program_id(1)          # block scan within the shard ("arbitrary")
    n_j = pl.num_programs(1)
    blk_rows = ir_ref.shape[0]

    # ---- per-core init (+ the small resident curve term, core 0 only) ----
    @pl.when(j == 0)
    def _init():
        img_acc[...] = jnp.zeros_like(img_acc)
        mis_acc[...] = jnp.zeros_like(mis_acc)
        if include_feat:
            fd = (fp_ref[...].astype(jnp.float32)
                  - fr_ref[...].astype(jnp.float32))
            fsum = jnp.sum((fd * fd).reshape(-1, 8, _LANES), axis=0)
            feat_acc[...] = jnp.where(c == 0, fsum, 0.0)
        else:
            feat_acc[...] = jnp.zeros_like(feat_acc)

    # ---- image partials: streamed block, chunked to bound VMEM temporaries ----
    row0 = (c * n_j + j) * blk_rows          # first (unclamped) slab row of this block

    def _accum(ir, ip):
        d = ip - ir
        img_acc[...] += jnp.sum((d * d).reshape(-1, 8, _LANES), axis=0)
        mism = (jnp.round(ir) != jnp.round(ip)).astype(jnp.float32)
        mis_acc[...] += jnp.sum(mism.reshape(-1, 8, _LANES), axis=0)

    def _chunks(masked):
        for s in range(0, blk_rows, _SUB_CHUNK_ROWS):
            rows_c = min(_SUB_CHUNK_ROWS, blk_rows - s)
            ir = ir_ref[pl.ds(s, rows_c), :].astype(jnp.float32)
            ip = ip_ref[pl.ds(s, rows_c), :].astype(jnp.float32)
            if masked:
                rid = row0 + s + jax.lax.broadcasted_iota(
                    jnp.int32, (rows_c, _LANES), 0)
                valid = rid < rows_imag
                # Mask the *loaded values* so garbage from the OOB tail cannot
                # reach the squared-error / round paths.
                ir = jnp.where(valid, ir, 0.0)
                ip = jnp.where(valid, ip, 0.0)
            _accum(ir, ip)

    is_full = row0 + blk_rows <= rows_imag

    @pl.when(is_full)
    def _full_block():                 # hot path: no mask work
        _chunks(masked=False)

    @pl.when(jnp.logical_not(is_full))
    def _tail_block():                 # at most once per core
        _chunks(masked=True)

    # ---- finalize: one cross-sublane/lane reduce per core ----
    @pl.when(j == n_j - 1)
    def _finalize():
        out_ref[0, 0] = jnp.sum(feat_acc[...])
        out_ref[0, 1] = jnp.sum(img_acc[...])
        out_ref[0, 2] = jnp.sum(mis_acc[...])


def tandem_loss(feat_real, feat_pred, imag_real, imag_pred, gamma=0.0,
                *, img_tile_bytes=_IMG_TILE_BYTES):
    """Pallas implementation of TandemLoss.forward. Returns (loss, accu) scalars."""
    assert feat_real.shape == feat_pred.shape
    assert imag_real.shape == imag_pred.shape
    assert feat_real.dtype == feat_pred.dtype
    assert imag_real.dtype == imag_pred.dtype

    n_feat = feat_real.size
    n_imag = imag_real.size

    # ---------- image slabs: lane-dense (rows, 128) with zero extra HBM traffic ----------
    mult_i = _sublane_multiple(imag_real.dtype)
    rows_raw = pl.cdiv(n_imag, _LANES)
    if n_imag % _LANES == 0 and rows_raw >= mult_i:
        ir = imag_real.reshape(rows_raw, _LANES)     # free reshape, no copy
        ip = imag_pred.reshape(rows_raw, _LANES)
    else:
        # Fallback (materializes a copy): lane-misaligned or tiny image.
        ir = _padded_slab(imag_real, mult_i)
        ip = _padded_slab(imag_pred, mult_i)
    rows_imag = ir.shape[0]

    itemsize = ir.dtype.itemsize
    max_rows = max(mult_i,
                   _round_down(img_tile_bytes // (_LANES * itemsize), mult_i))
    blk = min(max_rows, _round_down(rows_imag, mult_i))
    total_blocks = pl.cdiv(rows_imag, blk)
    num_cores = _NUM_CORES if total_blocks >= _NUM_CORES else 1
    bpc = pl.cdiv(total_blocks, num_cores)           # blocks per core

    # ---------- feat ("curve") slabs: fuse only if the resident footprint is small ----------
    mult_f = _sublane_multiple(feat_real.dtype)
    rows_f_est = _round_up(pl.cdiv(n_feat, _LANES), mult_f)
    include_feat = (2 * 2 * rows_f_est * _LANES
                    * feat_real.dtype.itemsize) <= _FEAT_FUSE_LIMIT_BYTES
    if include_feat:
        fr = _padded_slab(feat_real, mult_f)
        fp = _padded_slab(feat_pred, mult_f)

    # ---------- specs ----------
    def img_index_map(c, j):
        # Clamp so the DMA never starts past the array; fully-OOB iterations are
        # zeroed by the in-kernel row mask.
        return (jnp.minimum(c * bpc + j, total_blocks - 1), 0)

    img_spec = pl.BlockSpec((blk, _LANES), img_index_map)

    inputs, in_specs = [], []
    if include_feat:
        feat_spec = pl.BlockSpec((fr.shape[0], _LANES), lambda c, j: (0, 0))
        inputs += [fr, fp]
        in_specs += [feat_spec, feat_spec]
    inputs += [ir, ip]
    in_specs += [img_spec, img_spec]

    out_spec = pl.BlockSpec((1, 3), lambda c, j: (c, 0),
                            memory_space=pltpu.MemorySpace.SMEM)

    # Explicit VMEM budget: double-buffered image tiles + resident feat +
    # accumulators + chunk temporaries (needed on v5e whose default scoped
    # VMEM is only 16 MiB; stays well under v7x's 64 MiB physical VMEM).
    vmem_bytes = 2 * 2 * blk * _LANES * itemsize
    if include_feat:
        vmem_bytes += 2 * 2 * fr.shape[0] * _LANES * fr.dtype.itemsize
    vmem_bytes += 3 * 8 * _LANES * 4
    vmem_bytes += 8 * min(_SUB_CHUNK_ROWS, blk) * _LANES * 4
    vmem_limit = int(vmem_bytes) + (2 << 20)

    kernel = functools.partial(_tandem_partials_kernel,
                               rows_imag=rows_imag,
                               include_feat=include_feat)

    partials = pl.pallas_call(
        kernel,
        out_shape=jax.ShapeDtypeStruct((num_cores, 3), jnp.float32),
        grid_spec=pltpu.PrefetchScalarGridSpec(
            num_scalar_prefetch=0,
            grid=(num_cores, bpc),
            in_specs=in_specs,
            out_specs=out_spec,
            scratch_shapes=[pltpu.VMEM((8, _LANES), jnp.float32)] * 3,
        ),
        compiler_params=pltpu.CompilerParams(
            dimension_semantics=("parallel", "arbitrary"),
            vmem_limit_bytes=vmem_limit),
    )(*inputs)

    # ---------- tiny epilogue (per-core partials -> means -> gamma blend) ----------
    totals = jnp.sum(partials, axis=0)
    if include_feat:
        feat_sq = totals[0]
    else:
        # TODO(synk): large curve tensors could be tiled through the kernel grid
        # instead of this XLA fallback reduction.
        feat_sq = jnp.sum((feat_pred.astype(jnp.float32)
                           - feat_real.astype(jnp.float32)) ** 2)
    curve_loss = feat_sq / n_feat
    image_loss = totals[1] / n_imag
    accu = totals[2] / n_imag          # = 1 - mean(round(real) == round(pred))
    loss = (1.0 - gamma) * curve_loss + gamma * image_loss
    return loss, accu


def _tandem_loss_ref(feat_real, feat_pred, imag_real, imag_pred, gamma=0.0):
    curve_loss = jnp.mean((feat_pred - feat_real) ** 2)
    image_loss = jnp.mean((imag_pred - imag_real) ** 2)
    image_accu = 1.0 - jnp.mean(
        (jnp.round(imag_real) == jnp.round(imag_pred)).astype(jnp.float32))
    loss = (1.0 - gamma) * curve_loss + gamma * image_loss
    return loss, image_accu


def _check(feat_real, feat_pred, imag_real, imag_pred, gamma):
    loss, accu = tandem_loss(feat_real, feat_pred, imag_real, imag_pred,
                             gamma=gamma)
    loss = jax.block_until_ready(loss)
    accu = jax.block_until_ready(accu)
    ref_loss, ref_accu = _tandem_loss_ref(feat_real, feat_pred, imag_real,
                                          imag_pred, gamma=gamma)
    assert jnp.allclose(loss, ref_loss, rtol=1e-5, atol=1e-6), (loss, ref_loss)
    assert jnp.allclose(accu, ref_accu, rtol=1e-5, atol=1e-6), (accu, ref_accu)


if __name__ == "__main__":
    key = jax.random.PRNGKey(0)
    k = jax.random.split(key, 8)
    gamma = 0.3

    # Config 1: lane-aligned NCHW image (2, 4, 16, 16) -> no-pad fast path.
    B, F = 2, 32
    C, H, W = 4, 16, 16
    feat_real = jax.random.normal(k[0], (B, F), dtype=jnp.float32)
    feat_pred = feat_real + 0.1 * jax.random.normal(k[1], (B, F), dtype=jnp.float32)
    imag_real = jax.random.uniform(k[2], (B, C, H, W), dtype=jnp.float32)
    imag_pred = imag_real + 0.5 * jax.random.normal(k[3], (B, C, H, W), dtype=jnp.float32)
    _check(feat_real, feat_pred, imag_real, imag_pred, gamma)

    # Config 2: multi-block image with a ragged tail block (exercises the
    # 2-way core split, the clamped index map and the in-kernel tail mask),
    # plus a lane-misaligned feat tensor (padded small slab).
    feat_real2 = jax.random.normal(k[4], (5, 24), dtype=jnp.float32)
    feat_pred2 = feat_real2 + 0.2 * jax.random.normal(k[5], (5, 24), dtype=jnp.float32)
    imag_real2 = jax.random.uniform(k[6], (5, 4, 16, 8), dtype=jnp.float32)
    imag_pred2 = imag_real2 + 0.5 * jax.random.normal(k[7], (5, 4, 16, 8), dtype=jnp.float32)
    _check(feat_real2, feat_pred2, imag_real2, imag_pred2, gamma)

    print("KERNEL_OK")
</pallas_src>

<mosaic_0001>
module attributes {stable_mosaic.version = 11 : i64} {
  func.func @_tandem_partials_kernel(%arg0: i32, %arg1: i32, %arg2: memref<8x128xf32, #tpu.memory_space<vmem>>, %arg3: memref<8x128xf32, #tpu.memory_space<vmem>>, %arg4: memref<16x128xf32, #tpu.memory_space<vmem>>, %arg5: memref<16x128xf32, #tpu.memory_space<vmem>>, %arg6: memref<1x3xf32, #tpu.memory_space<smem>>, %arg7: memref<8x128xf32, #tpu.memory_space<vmem>>, %arg8: memref<8x128xf32, #tpu.memory_space<vmem>>, %arg9: memref<8x128xf32, #tpu.memory_space<vmem>>) attributes {dimension_semantics = [#tpu.dimension_semantics<parallel>, #tpu.dimension_semantics<arbitrary>], iteration_bounds = array<i64: 1, 1>, scalar_prefetch = 0 : i64, scratch_operands = 3 : i64, tpu.core_type = #tpu.core_type<tc>, window_params = [{pipeline_mode = #tpu.pipeline_mode<synchronous>, transform_indices = @transform_0, window_bounds = array<i64: 8, 128>}, {pipeline_mode = #tpu.pipeline_mode<synchronous>, transform_indices = @transform_1, window_bounds = array<i64: 8, 128>}, {transform_indices = @transform_2, window_bounds = array<i64: 16, 128>}, {transform_indices = @transform_3, window_bounds = array<i64: 16, 128>}, {transform_indices = @transform_4, window_bounds = array<i64: 1, 3>}]} {
    %c0_i32 = arith.constant 0 : i32
    %0 = arith.cmpi eq, %arg1, %c0_i32 : i32
    %1 = arith.extui %0 : i1 to i32
    %c0_i32_0 = arith.constant 0 : i32
    %2 = arith.cmpi ne, %1, %c0_i32_0 : i32
    scf.if %2 {
      %cst = arith.constant 0.000000e+00 : f32
      %16 = vector.broadcast %cst : f32 to vector<8x128xf32>
      %c0 = arith.constant 0 : index
      %c0_7 = arith.constant 0 : index
      %17 = vector.load %arg8[%c0, %c0_7] : memref<8x128xf32, #tpu.memory_space<vmem>>, vector<8x128xf32>
      tpu.vector_store %arg8[%c0, %c0_7], %16 {strides = array<i32>} : memref<8x128xf32, #tpu.memory_space<vmem>>, vector<8x128xf32>,
      %cst_8 = arith.constant 0.000000e+00 : f32
      %18 = vector.broadcast %cst_8 : f32 to vector<8x128xf32>
      %c0_9 = arith.constant 0 : index
      %c0_10 = arith.constant 0 : index
      %19 = vector.load %arg9[%c0_9, %c0_10] : memref<8x128xf32, #tpu.memory_space<vmem>>, vector<8x128xf32>
      tpu.vector_store %arg9[%c0_9, %c0_10], %18 {strides = array<i32>} : memref<8x128xf32, #tpu.memory_space<vmem>>, vector<8x128xf32>,
      %c0_11 = arith.constant 0 : index
      %c0_12 = arith.constant 0 : index
      %20 = vector.load %arg3[%c0_11, %c0_12] : memref<8x128xf32, #tpu.memory_space<vmem>>, vector<8x128xf32>
      %c0_13 = arith.constant 0 : index
      %c0_14 = arith.constant 0 : index
      %21 = vector.load %arg2[%c0_13, %c0_14] : memref<8x128xf32, #tpu.memory_space<vmem>>, vector<8x128xf32>
      %22 = arith.subf %20, %21 : vector<8x128xf32>
      %23 = arith.mulf %22, %22 : vector<8x128xf32>
      %24 = vector.shape_cast %23 : vector<8x128xf32> to vector<1x8x128xf32>
      %cst_15 = arith.constant dense<0.000000e+00> : vector<8x128xf32>
      %25 = vector.multi_reduction <add>, %24, %cst_15 [0] : vector<1x8x128xf32> to vector<8x128xf32>
      %c0_i32_16 = arith.constant 0 : i32
      %26 = arith.cmpi eq, %arg0, %c0_i32_16 : i32
      %cst_17 = arith.constant 0.000000e+00 : f32
      %27 = vector.broadcast %cst_17 : f32 to vector<8x128xf32>
      %28 = arith.select %26, %25, %27 : vector<8x128xf32>
      %c0_18 = arith.constant 0 : index
      %c0_19 = arith.constant 0 : index
      %29 = vector.load %arg7[%c0_18, %c0_19] : memref<8x128xf32, #tpu.memory_space<vmem>>, vector<8x128xf32>
      tpu.vector_store %arg7[%c0_18, %c0_19], %28 {strides = array<i32>} : memref<8x128xf32, #tpu.memory_space<vmem>>, vector<8x128xf32>,
    } else {
    }
    %c1_i32 = arith.constant 1 : i32
    %3 = arith.muli %arg0, %c1_i32 : i32
    %4 = arith.addi %3, %arg1 : i32
    %c16_i32 = arith.constant 16 : i32
    %5 = arith.muli %4, %c16_i32 : i32
    %c16_i32_1 = arith.constant 16 : i32
    %6 = arith.addi %5, %c16_i32_1 : i32
    %c16_i32_2 = arith.constant 16 : i32
    %7 = arith.cmpi sle, %6, %c16_i32_2 : i32
    %8 = arith.extui %7 : i1 to i32
    %c0_i32_3 = arith.constant 0 : i32
    %9 = arith.cmpi ne, %8, %c0_i32_3 : i32
    scf.if %9 {
      %c0 = arith.constant 0 : index
      %c0_7 = arith.constant 0 : index
      %16 = vector.load %arg4[%c0, %c0_7] : memref<16x128xf32, #tpu.memory_space<vmem>>, vector<16x128xf32>
      %c0_8 = arith.constant 0 : index
      %c0_9 = arith.constant 0 : index
      %17 = vector.load %arg5[%c0_8, %c0_9] : memref<16x128xf32, #tpu.memory_space<vmem>>, vector<16x128xf32>
      %18 = arith.subf %17, %16 : vector<16x128xf32>
      %c0_10 = arith.constant 0 : index
      %c0_11 = arith.constant 0 : index
      %19 = vector.load %arg8[%c0_10, %c0_11] : memref<8x128xf32, #tpu.memory_space<vmem>>, vector<8x128xf32>
      %20 = arith.mulf %18, %18 : vector<16x128xf32>
      %21 = vector.shape_cast %20 : vector<16x128xf32> to vector<2x8x128xf32>
      %cst = arith.constant dense<0.000000e+00> : vector<8x128xf32>
      %22 = vector.multi_reduction <add>, %21, %cst [0] : vector<2x8x128xf32> to vector<8x128xf32>
      %23 = arith.addf %19, %22 : vector<8x128xf32>
      %c0_12 = arith.constant 0 : index
      %c0_13 = arith.constant 0 : index
      %24 = vector.load %arg8[%c0_12, %c0_13] : memref<8x128xf32, #tpu.memory_space<vmem>>, vector<8x128xf32>
      tpu.vector_store %arg8[%c0_12, %c0_13], %23 {strides = array<i32>} : memref<8x128xf32, #tpu.memory_space<vmem>>, vector<8x128xf32>,
      %25 = math.roundeven %16 : vector<16x128xf32>
      %26 = math.roundeven %17 : vector<16x128xf32>
      %27 = arith.cmpf one, %25, %26 : vector<16x128xf32>
      %28 = arith.extui %27 : vector<16x128xi1> to vector<16x128xi32>
      %29 = arith.sitofp %28 : vector<16x128xi32> to vector<16x128xf32>
      %c0_14 = arith.constant 0 : index
      %c0_15 = arith.constant 0 : index
      %30 = vector.load %arg9[%c0_14, %c0_15] : memref<8x128xf32, #tpu.memory_space<vmem>>, vector<8x128xf32>
      %31 = vector.shape_cast %29 : vector<16x128xf32> to vector<2x8x128xf32>
      %cst_16 = arith.constant dense<0.000000e+00> : vector<8x128xf32>
      %32 = vector.multi_reduction <add>, %31, %cst_16 [0] : vector<2x8x128xf32> to vector<8x128xf32>
      %33 = arith.addf %30, %32 : vector<8x128xf32>
      %c0_17 = arith.constant 0 : index
      %c0_18 = arith.constant 0 : index
      %34 = vector.load %arg9[%c0_17, %c0_18] : memref<8x128xf32, #tpu.memory_space<vmem>>, vector<8x128xf32>
      tpu.vector_store %arg9[%c0_17, %c0_18], %33 {strides = array<i32>} : memref<8x128xf32, #tpu.memory_space<vmem>>, vector<8x128xf32>,
    } else {
    }
    %true = arith.constant true
    %10 = arith.xori %7, %true : i1
    %11 = arith.extui %10 : i1 to i32
    %c0_i32_4 = arith.constant 0 : i32
    %12 = arith.cmpi ne, %11, %c0_i32_4 : i32
    scf.if %12 {
      %c0 = arith.constant 0 : index
      %c0_7 = arith.constant 0 : index
      %16 = vector.load %arg4[%c0, %c0_7] : memref<16x128xf32, #tpu.memory_space<vmem>>, vector<16x128xf32>
      %c0_8 = arith.constant 0 : index
      %c0_9 = arith.constant 0 : index
      %17 = vector.load %arg5[%c0_8, %c0_9] : memref<16x128xf32, #tpu.memory_space<vmem>>, vector<16x128xf32>
      %c0_i32_10 = arith.constant 0 : i32
      %18 = arith.addi %5, %c0_i32_10 : i32
      %19 = tpu.iota {dimensions = array<i32: 0>} : vector<16x128xi32>
      %20 = vector.broadcast %18 : i32 to vector<16x128xi32>
      %21 = arith.addi %20, %19 : vector<16x128xi32>
      %c16_i32_11 = arith.constant 16 : i32
      %22 = vector.broadcast %c16_i32_11 : i32 to vector<16x128xi32>
      %23 = arith.cmpi slt, %21, %22 : vector<16x128xi32>
      %cst = arith.constant 0.000000e+00 : f32
      %24 = vector.broadcast %cst : f32 to vector<16x128xf32>
      %25 = arith.select %23, %16, %24 : vector<16x128xi1>, vector<16x128xf32>
      %cst_12 = arith.constant 0.000000e+00 : f32
      %26 = vector.broadcast %cst_12 : f32 to vector<16x128xf32>
      %27 = arith.select %23, %17, %26 : vector<16x128xi1>, vector<16x128xf32>
      %28 = arith.subf %27, %25 : vector<16x128xf32>
      %c0_13 = arith.constant 0 : index
      %c0_14 = arith.constant 0 : index
      %29 = vector.load %arg8[%c0_13, %c0_14] : memref<8x128xf32, #tpu.memory_space<vmem>>, vector<8x128xf32>
      %30 = arith.mulf %28, %28 : vector<16x128xf32>
      %31 = vector.shape_cast %30 : vector<16x128xf32> to vector<2x8x128xf32>
      %cst_15 = arith.constant dense<0.000000e+00> : vector<8x128xf32>
      %32 = vector.multi_reduction <add>, %31, %cst_15 [0] : vector<2x8x128xf32> to vector<8x128xf32>
      %33 = arith.addf %29, %32 : vector<8x128xf32>
      %c0_16 = arith.constant 0 : index
      %c0_17 = arith.constant 0 : index
      %34 = vector.load %arg8[%c0_16, %c0_17] : memref<8x128xf32, #tpu.memory_space<vmem>>, vector<8x128xf32>
      tpu.vector_store %arg8[%c0_16, %c0_17], %33 {strides = array<i32>} : memref<8x128xf32, #tpu.memory_space<vmem>>, vector<8x128xf32>,
      %35 = math.roundeven %25 : vector<16x128xf32>
      %36 = math.roundeven %27 : vector<16x128xf32>
      %37 = arith.cmpf one, %35, %36 : vector<16x128xf32>
      %38 = arith.extui %37 : vector<16x128xi1> to vector<16x128xi32>
      %39 = arith.sitofp %38 : vector<16x128xi32> to vector<16x128xf32>
      %c0_18 = arith.constant 0 : index
      %c0_19 = arith.constant 0 : index
      %40 = vector.load %arg9[%c0_18, %c0_19] : memref<8x128xf32, #tpu.memory_space<vmem>>, vector<8x128xf32>
      %41 = vector.shape_cast %39 : vector<16x128xf32> to vector<2x8x128xf32>
      %cst_20 = arith.constant dense<0.000000e+00> : vector<8x128xf32>
      %42 = vector.multi_reduction <add>, %41, %cst_20 [0] : vector<2x8x128xf32> to vector<8x128xf32>
      %43 = arith.addf %40, %42 : vector<8x128xf32>
      %c0_21 = arith.constant 0 : index
      %c0_22 = arith.constant 0 : index
      %44 = vector.load %arg9[%c0_21, %c0_22] : memref<8x128xf32, #tpu.memory_space<vmem>>, vector<8x128xf32>
      tpu.vector_store %arg9[%c0_21, %c0_22], %43 {strides = array<i32>} : memref<8x128xf32, #tpu.memory_space<vmem>>, vector<8x128xf32>,
    } else {
    }
    %c0_i32_5 = arith.constant 0 : i32
    %13 = arith.cmpi eq, %arg1, %c0_i32_5 : i32
    %14 = arith.extui %13 : i1 to i32
    %c0_i32_6 = arith.constant 0 : i32
    %15 = arith.cmpi ne, %14, %c0_i32_6 : i32
    scf.if %15 {
      %c0 = arith.constant 0 : index
      %c0_7 = arith.constant 0 : index
      %16 = vector.load %arg7[%c0, %c0_7] : memref<8x128xf32, #tpu.memory_space<vmem>>, vector<8x128xf32>
      %17 = vector.shape_cast %16 : vector<8x128xf32> to vector<1x8x128xf32>
      %cst = arith.constant dense<0.000000e+00> : vector<1xf32>
      %18 = vector.multi_reduction <add>, %17, %cst [1, 2] : vector<1x8x128xf32> to vector<1xf32>
      %19 = vector.shape_cast %18 : vector<1xf32> to vector<1x1x1xf32>
      %20 = vector.extract %19[0, 0, 0] : f32 from vector<1x1x1xf32>
      %c0_8 = arith.constant 0 : index
      %c0_9 = arith.constant 0 : index
      %21 = memref.load %arg6[%c0_8, %c0_9] : memref<1x3xf32, #tpu.memory_space<smem>>
      memref.store %20, %arg6[%c0_8, %c0_9] : memref<1x3xf32, #tpu.memory_space<smem>>
      %c0_10 = arith.constant 0 : index
      %c0_11 = arith.constant 0 : index
      %22 = vector.load %arg8[%c0_10, %c0_11] : memref<8x128xf32, #tpu.memory_space<vmem>>, vector<8x128xf32>
      %23 = vector.shape_cast %22 : vector<8x128xf32> to vector<1x8x128xf32>
      %cst_12 = arith.constant dense<0.000000e+00> : vector<1xf32>
      %24 = vector.multi_reduction <add>, %23, %cst_12 [1, 2] : vector<1x8x128xf32> to vector<1xf32>
      %25 = vector.shape_cast %24 : vector<1xf32> to vector<1x1x1xf32>
      %26 = vector.extract %25[0, 0, 0] : f32 from vector<1x1x1xf32>
      %c0_13 = arith.constant 0 : index
      %c1 = arith.constant 1 : index
      %27 = memref.load %arg6[%c0_13, %c1] : memref<1x3xf32, #tpu.memory_space<smem>>
      memref.store %26, %arg6[%c0_13, %c1] : memref<1x3xf32, #tpu.memory_space<smem>>
      %c0_14 = arith.constant 0 : index
      %c0_15 = arith.constant 0 : index
      %28 = vector.load %arg9[%c0_14, %c0_15] : memref<8x128xf32, #tpu.memory_space<vmem>>, vector<8x128xf32>
      %29 = vector.shape_cast %28 : vector<8x128xf32> to vector<1x8x128xf32>
      %cst_16 = arith.constant dense<0.000000e+00> : vector<1xf32>
      %30 = vector.multi_reduction <add>, %29, %cst_16 [1, 2] : vector<1x8x128xf32> to vector<1xf32>
      %31 = vector.shape_cast %30 : vector<1xf32> to vector<1x1x1xf32>
      %32 = vector.extract %31[0, 0, 0] : f32 from vector<1x1x1xf32>
      %c0_17 = arith.constant 0 : index
      %c2 = arith.constant 2 : index
      %33 = memref.load %arg6[%c0_17, %c2] : memref<1x3xf32, #tpu.memory_space<smem>>
      memref.store %32, %arg6[%c0_17, %c2] : memref<1x3xf32, #tpu.memory_space<smem>>
    } else {
    }
    return
  }
  func.func @transform_0(%arg0: i32, %arg1: i32) -> (i32, i32) {
    %c0_i32 = arith.constant 0 : i32
    %c0_i32_0 = arith.constant 0 : i32
    %c0_i32_1 = arith.constant 0 : i32
    return %c0_i32, %c0_i32_0 : i32, i32
  }
  func.func @transform_1(%arg0: i32, %arg1: i32) -> (i32, i32) {
    %c0_i32 = arith.constant 0 : i32
    %c0_i32_0 = arith.constant 0 : i32
    %c0_i32_1 = arith.constant 0 : i32
    return %c0_i32, %c0_i32_0 : i32, i32
  }
  func.func @transform_2(%arg0: i32, %arg1: i32) -> (i32, i32) {
    %c1_i32 = arith.constant 1 : i32
    %0 = arith.muli %arg0, %c1_i32 : i32
    %1 = arith.addi %0, %arg1 : i32
    %c0_i32 = arith.constant 0 : i32
    %2 = arith.minsi %1, %c0_i32 : i32
    %c0_i32_0 = arith.constant 0 : i32
    %c0_i32_1 = arith.constant 0 : i32
    return %2, %c0_i32_0 : i32, i32
  }
  func.func @transform_3(%arg0: i32, %arg1: i32) -> (i32, i32) {
    %c1_i32 = arith.constant 1 : i32
    %0 = arith.muli %arg0, %c1_i32 : i32
    %1 = arith.addi %0, %arg1 : i32
    %c0_i32 = arith.constant 0 : i32
    %2 = arith.minsi %1, %c0_i32 : i32
    %c0_i32_0 = arith.constant 0 : i32
    %c0_i32_1 = arith.constant 0 : i32
    return %2, %c0_i32_0 : i32, i32
  }
  func.func @transform_4(%arg0: i32, %arg1: i32) -> (i32, i32) {
    %c0_i32 = arith.constant 0 : i32
    %c0_i32_0 = arith.constant 0 : i32
    return %arg0, %c0_i32 : i32, i32
  }
}

</mosaic_0001>

<bundles_post_ra>
// kernel: tpu_custom_call.1
= control target key start
LH: loop header
LB: loop body
LE: loop exit
PB: predicated region body
PF: predicated region fallthrough
CT: control target
= control target key end

     0   :  { %9 = vsyncpa [#allocation6], 0  ;;  %s470_s0 = inlined_call_operand.hbm [shape: f32[8,128], index: 0, kind: input, shape index: {}]   ;;  %s471_s1 = inlined_call_operand.hbm [shape: f32[8,128], index: 1, kind: input, shape index: {}]   ;;  %s472_s2 = inlined_call_operand.hbm [shape: f32[16,128], index: 2, kind: input, shape index: {}]   ;;  %s473_s3 = inlined_call_operand.hbm [shape: f32[16,128], index: 3, kind: input, shape index: {}]   ;;  %s474_s4 = inlined_call_operand.hbm [shape: f32[1,3], index: 4, kind: output, shape index: {}]  }
   0x1   :  { %10 = vsyncpa [#allocation9], 0 }
   0x2   :  { %11 = vsyncpa [#allocation12], 0  ;;  %s29_s17 = sshll.u32 %s471_s1, 4  ;;  %s30_s17 = int_to_ptr.hbm [resolvable:$true] %s29_s17 }
   0x3   :  { %12 = vsyncpa [#allocation7], 0  ;;  %s416_s18 = smov [#allocation8]   ;;  %s18_s22 = sshll.u32 %s470_s0, 4  ;;  %s19_s22 = int_to_ptr.hbm [resolvable:$true] %s18_s22 }
   0x4   :  { %s31_s19 = sshll.u32 %s416_s18, 4  ;;  %s417_s23 = smov [#allocation5]   ;;  %s32_s19 = int_to_ptr.vmem [resolvable:$true] %s31_s19 }
   0x5   :  { %34 = dma.hbm_to_vmem [thread:$0]  %s30_s17, 128, %s32_s19, [#allocation9]  }
   0x6   :  { %s20_s24 = sshll.u32 %s417_s23, 4  ;;  %s45_s27 = sshll.u32 %s472_s2, 4  ;;  %s21_s24 = int_to_ptr.vmem [resolvable:$true] %s20_s24  ;;  %s46_s27 = int_to_ptr.hbm [resolvable:$true] %s45_s27 }
   0x7   :  { %23 = dma.hbm_to_vmem [thread:$0]  %s19_s22, 128, %s21_s24, [#allocation6]  }
   0x8   :  { %s418_s1 = smov [#allocation10]   ;;  %s64_s5 = sshll.u32 %s473_s3, 4  ;;  %s65_s5 = int_to_ptr.hbm [resolvable:$true] %s64_s5 }
   0x9   :  { %s47_s28 = sshll.u32 %s418_s1, 4  ;;  %s419_s6 = smov 128   ;;  %s48_s28 = int_to_ptr.vmem [resolvable:$true] %s47_s28 }
   0xa   :  { %s420_s0 = smov 8   ;;  %s421_s7 = smov [#allocation11]  }
   0xb   :  { %53 = dma.hbm_to_vmem [thread:$0]  %s46_s27, 256, %s48_s28, [#allocation9], %s419_s6, %s419_s6, %s420_s0  }
   0xc   :  { %s66_s8 = sshll.u32 %s421_s7, 4  ;;  %s67_s8 = int_to_ptr.vmem [resolvable:$true] %s66_s8 }
   0xd   :  { %72 = dma.hbm_to_vmem [thread:$0]  %s65_s5, 256, %s67_s8, [#allocation12], %s419_s6, %s419_s6, %s420_s0  }
   0xe   :  { %408 = dma.done.wait [#allocation6], 128  }
   0xf   :  { %409 = vsyncadd [#allocation6], 4294967168 }
  0x10   :  { %410 = dma.done.wait [#allocation9], 384  }
  0x11   :  { %411 = vsyncadd [#allocation9], 4294966912 }
  0x12   :  { %412 = dma.done.wait [#allocation12], 256  }
  0x13   :  { %413 = vsyncadd [#allocation12], 4294967040  ;;  %v103_v0 = vld [vmem:[#allocation8] sm:$0xff]  ;;  %v104_v1 = vld [vmem:[#allocation5] sm:$0xff]  ;;  %v422_v42 = vmov 0.0   ;;  %s233_s11 = sshll.u32 %s474_s4, 4  ;;  %s234_s11 = int_to_ptr.hbm [resolvable:$true] %s233_s11 }
  0x14   :  { %v121_v2 = vld [vmem:[#allocation10] sm:$0xff]  ;;  %v105_v3 = vsub.f32 %v103_v0, %v104_v1  ;;  %v122_v4 = vld [vmem:[#allocation10 + $0x8] sm:$0xff]  ;;  %v123_v5 = vld [vmem:[#allocation11] sm:$0xff]  ;;  %s423_s13 = smov [#allocation13]  }
  0x15   :  { %v124_v6 = vld [vmem:[#allocation11 + $0x8] sm:$0xff]  ;;  %v256_v7 = vcvt.f32.s32 %v121_v2  ;;  %v125_v8 = vsub.f32 %v123_v5, %v121_v2  ;;  %v264_v10 = vcvt.f32.s32 %v122_v4  ;;  %v259_v13 = vand.u32 2147483648, %v121_v2 }
  0x16   :  { %v126_v9 = vsub.f32 %v124_v6, %v122_v4  ;;  %v106_v11 = vmul.f32 %v105_v3, %v105_v3  ;;  %v254_v14 = vand.u32 2147483647, %v121_v2  ;;  %v262_v15 = vand.u32 2147483647, %v122_v4 }
  0x17   :  { %v257_v12 = vcvt.s32.f32 %v256_v7  ;;  %v265_v16 = vcvt.s32.f32 %v264_v10  ;;  %v267_v17 = vand.u32 2147483648, %v122_v4  ;;  %v128_v18 = vmul.f32 %v125_v8, %v125_v8 }
  0x18   :  { %193 = vadd.xlane.f32.xlu0 %v106_v11  ;;  %v129_v19 = vmul.f32 %v126_v9, %v126_v9  ;;  %v272_v21 = vcvt.f32.s32 %v123_v5  ;;  %v270_v23 = vand.u32 2147483647, %v123_v5  ;;  %v280_v24 = vcvt.f32.s32 %v124_v6 }
  0x19   :  { %v258_v20 = vand.u32 2147483647, %v257_v12  ;;  %v266_v22 = vand.u32 2147483647, %v265_v16  ;;  %v275_v27 = vand.u32 2147483648, %v123_v5  ;;  %vm461_vm0 = vcmp.lt.f32.partialorder %v254_v14, 8388608.0 }
  0x1a   :  { %v273_v26 = vcvt.s32.f32 %v272_v21  ;;  %v278_v28 = vand.u32 2147483647, %v124_v6  ;;  %v281_v31 = vcvt.s32.f32 %v280_v24  ;;  %v283_v32 = vand.u32 2147483648, %v124_v6 }
  0x1b   :  { %v260_v25 = vor.u32 %v259_v13, %v258_v20  ;;  %v268_v30 = vor.u32 %v267_v17, %v266_v22  ;;  %v130_v33 = vadd.f32 %v129_v19, %v128_v18  ;;  %vm263_vm1 = vcmp.lt.f32.partialorder %v262_v15, 8388608.0 }
  0x1c   :  { %v274_v34 = vand.u32 2147483647, %v273_v26  ;;  %vm271_vm2 = vcmp.lt.f32.partialorder %v270_v23, 8388608.0  ;;  %v282_v35 = vand.u32 2147483647, %v281_v31  ;;  %vm279_vm3 = vcmp.lt.f32.partialorder %v278_v28, 8388608.0 }
  0x1d   :  { %v261_v36 = vsel %vm461_vm0, %v260_v25, %v121_v2  ;;  %v269_v38 = vsel %vm263_vm1, %v268_v30, %v122_v4 }
  0x1e   :  { %v276_v37 = vor.u32 %v275_v27, %v274_v34  ;;  %v284_v39 = vor.u32 %v283_v32, %v282_v35 }
  0x20   :  { %205 = vadd.xlane.f32.xlu0 %v130_v33  ;;  %v277_v40 = vsel %vm271_vm2, %v276_v37, %v123_v5  ;;  %v285_v41 = vsel %vm279_vm3, %v284_v39, %v124_v6 }
  0x21   :  { %vm137_vm4 = vcmp.ne.f32.partialorder %v261_v36, %v277_v40  ;;  %vm138_vm5 = vcmp.ne.f32.partialorder %v269_v38, %v285_v41 }
  0x22   :  { %v250_v43 = vsel %vm137_vm4, 1.0, %v422_v42  ;;  %v251_v44 = vsel %vm138_vm5, 1.0, %v422_v42 }
  0x23   :  { %v144_v45 = vadd.f32 %v251_v44, %v250_v43 }
  0x25   :  { %217 = vadd.xlane.f32.xlu1 %v144_v45 }
  0x8b   :  { %v194_v46 = vpop.xlane.xlu0 %193 }
  0x8c   :  { %v195_v47 = vrot.slane %v194_v46, 4 }
  0x8e   :  { %v196_v48 = vadd.f32 %v195_v47, %v194_v46 }
  0x90   :  { %v197_v49 = vrot.slane %v196_v48, 2 }
  0x92   :  { %v198_v50 = vadd.f32 %v197_v49, %v196_v48 }
  0x93   :  { %v206_v51 = vpop.xlane.xlu0 %205 }
  0x94   :  { %v207_v52 = vrot.slane %v206_v51, 4  ;;  %v199_v53 = vrot.slane %v198_v50, 1 }
  0x96   :  { %v208_v54 = vadd.f32 %v207_v52, %v206_v51  ;;  %v200_v55 = vadd.f32 %v199_v53, %v198_v50 }
  0x98   :  { %v209_v56 = vrot.slane %v208_v54, 2  ;;  %286 = vpush %v200_v55  ;;  %v218_v57 = vpop.xlane.xlu1 %217 }
  0x99   :  { %v219_v59 = vrot.slane %v218_v57, 4 }
  0x9a   :  { %v210_v58 = vadd.f32 %v209_v56, %v208_v54 }
  0x9b   :  { %v220_v60 = vadd.f32 %v219_v59, %v218_v57 }
  0x9c   :  { %v211_v61 = vrot.slane %v210_v58, 1 }
  0x9d   :  { %v221_v62 = vrot.slane %v220_v60, 2 }
  0x9e   :  { %v212_v63 = vadd.f32 %v211_v61, %v210_v58 }
  0x9f   :  { %v222_v0 = vadd.f32 %v221_v62, %v220_v60 }
  0xa0   :  { %288 = vpush %v212_v63 }
  0xa1   :  { %v223_v1 = vrot.slane %v222_v0, 1 }
  0xa3   :  { %v224_v2 = vadd.f32 %v223_v1, %v222_v0 }
  0xa5   :  { %290 = vpush %v224_v2 }
  0xc9   :  { %s287_s2 = spop %286 }
  0xca   :  { %203 = sst [smem:[#allocation13]] %s287_s2 }
  0xd1   :  { %s289_s3 = spop %288 }
  0xd2   :  { %215 = sst [smem:[#allocation13 + $0x1]] %s289_s3 }
  0xd6   :  { %s291_s12 = spop %290 }
  0xd7   :  { %227 = sst [smem:[#allocation13 + $0x2]] %s291_s12 }
  0xd8   :  { %236 = dma.smem_to_hbm %s423_s13, 16, %s234_s11, [#allocation7]  }
  0xd9   :  { %414 = dma.done.wait [#allocation7], 16  }
  0xda   :  { %415 = vsyncadd [#allocation7], 4294967280 }
  0xdb   :  { %241 = sfence }
  0xdc   :  { %242 = vsyncpa [#allocation6], 1 }
  0xdd   :  { %243 = vsyncpa [#allocation9], 1 }
  0xde   :  { %244 = vsyncpa [#allocation12], 1 }
  0xdf   :  { %245 = vsyncpa [#allocation7], 1 }

</bundles_post_ra>
